<compile_context>
chip_gen: v6e
topology: v6e:2x2x1
jax: 0.10.0
libtpu: 0.0.40
codegen_flags: <defaults>
</compile_context>

<pallas_src>
import functools

import jax
import jax.numpy as jnp
from jax.experimental import pallas as pl
from jax.experimental.pallas import tpu as pltpu

_LANES = 128
_MAX_CHUNK_ROWS = 512


def _wbce_kernel(preds_ref, target_ref, weight_ref, out_ref,
                 acc_w, acc_w2, acc_b, acc_wb, *,
                 min_weight, var_scale, base_loss_ratio, n, chunk_rows):
    pid = pl.program_id(0)

    @pl.when(pid == 0)
    def _init():
        acc_w[...] = jnp.zeros_like(acc_w)
        acc_w2[...] = jnp.zeros_like(acc_w2)
        acc_b[...] = jnp.zeros_like(acc_b)
        acc_wb[...] = jnp.zeros_like(acc_wb)

    preds = preds_ref[...]     # (chunk_rows, 128) f32
    target = target_ref[...]
    weight = weight_ref[...]

    # Mask out padded tail elements (global flat index >= n).
    row = jax.lax.broadcasted_iota(jnp.int32, preds.shape, 0)
    col = jax.lax.broadcasted_iota(jnp.int32, preds.shape, 1)
    gidx = (pid * chunk_rows + row) * _LANES + col
    valid = gidx < n

    safe_w = jnp.where(valid, weight + jnp.float32(min_weight), 0.0)

    # t*log_sigmoid(p) + (1-t)*log_sigmoid(-p) == t*p - log(1+exp(p)),
    # so bce = -(...) = log(1+exp(p)) - t*p   (matches torch formulation exactly).
    bce = jnp.where(valid, jnp.log(1.0 + jnp.exp(preds)) - target * preds, 0.0)

    # Per-lane (sublane-reduced) partial sums accumulated across the grid.
    acc_w[...] += jnp.sum(safe_w, axis=0, keepdims=True)
    acc_w2[...] += jnp.sum(safe_w * safe_w, axis=0, keepdims=True)
    acc_b[...] += jnp.sum(bce, axis=0, keepdims=True)
    acc_wb[...] += jnp.sum(safe_w * bce, axis=0, keepdims=True)

    @pl.when(pid == pl.num_programs(0) - 1)
    def _finalize():
        n_f = jnp.float32(n)
        s_w = jnp.sum(acc_w[...])
        s_w2 = jnp.sum(acc_w2[...])
        s_b = jnp.sum(acc_b[...])
        s_wb = jnp.sum(acc_wb[...])

        scaled_bce = s_wb / s_w
        total = (s_b * jnp.float32(base_loss_ratio)
                 + scaled_bce * jnp.float32(1.0 - base_loss_ratio))

        # norm_w = (w+eps) * n / S_w  =>  sum(norm_w) == n, mean == 1.
        # unbiased var = (sum(norm_w^2) - n) / (n - 1)
        var = ((n_f / s_w) * (n_f / s_w) * s_w2 - n_f) / (n_f - 1.0)

        out_ref[0, 0] = total + var * jnp.float32(var_scale)


def weighted_logits_bce(preds, target, weight=None, *,
                        var_scale=0.05, min_weight=0.0001, base_loss_ratio=0.5):
    """JAX/Pallas equivalent of WeightedLogitsBCE.forward. Returns a scalar."""
    preds = jnp.asarray(preds, jnp.float32)
    target = jnp.asarray(target, jnp.float32)
    if weight is None:
        weight = jnp.ones(preds.shape, jnp.float32)
    weight = jnp.asarray(weight, jnp.float32)

    assert preds.ndim == 1 and target.shape == preds.shape
    assert weight.ndim == 1 and weight.shape == preds.shape
    # (the runtime `(weight >= 0).all()` / isnan asserts have no traced equivalent)
    n = preds.shape[0]
    assert n >= 2, "unbiased variance needs at least 2 elements (as in torch)"

    rows = pl.cdiv(n, _LANES)
    if rows <= _MAX_CHUNK_ROWS:
        chunk_rows = ((rows + 7) // 8) * 8      # single chunk, sublane-aligned
    else:
        chunk_rows = _MAX_CHUNK_ROWS
    num_chunks = pl.cdiv(rows, chunk_rows)
    padded_rows = num_chunks * chunk_rows
    padded_n = padded_rows * _LANES

    def pack(x):
        return jnp.pad(x, (0, padded_n - n)).reshape(padded_rows, _LANES)

    preds2, target2, weight2 = pack(preds), pack(target), pack(weight)

    kernel = functools.partial(
        _wbce_kernel,
        min_weight=min_weight,
        var_scale=var_scale,
        base_loss_ratio=base_loss_ratio,
        n=n,
        chunk_rows=chunk_rows,
    )

    in_spec = pl.BlockSpec((chunk_rows, _LANES), lambda i: (i, 0))
    out = pl.pallas_call(
        kernel,
        out_shape=jax.ShapeDtypeStruct((1, 1), jnp.float32),
        grid=(num_chunks,),
        in_specs=[in_spec, in_spec, in_spec],
        out_specs=pl.BlockSpec((1, 1), lambda i: (0, 0),
                               memory_space=pltpu.MemorySpace.SMEM),
        scratch_shapes=[pltpu.VMEM((1, _LANES), jnp.float32)] * 4,
        compiler_params=pltpu.CompilerParams(
            dimension_semantics=("arbitrary",)),
    )(preds2, target2, weight2)

    return out[0, 0]


def _reference(preds, target, weight, *,
               var_scale=0.05, min_weight=0.0001, base_loss_ratio=0.5):
    """Plain-JAX reference mirroring the PyTorch module exactly."""
    n = preds.shape[0]
    safe_w = weight + min_weight
    scaled_w = safe_w / jnp.sum(safe_w)
    norm_w = scaled_w * n
    log_sig = preds - jnp.log(1.0 + jnp.exp(preds))
    ilog_sig = -preds - jnp.log(1.0 + jnp.exp(-preds))
    bce = -1.0 * (target * log_sig + (1.0 - target) * ilog_sig)
    total = (jnp.sum(bce) * base_loss_ratio
             + jnp.dot(scaled_w, bce) * (1.0 - base_loss_ratio))
    var = jnp.var(norm_w, ddof=1)
    return total + var * var_scale


if __name__ == "__main__":
    key = jax.random.PRNGKey(0)
    k1, k2, k3 = jax.random.split(key, 3)

    # 1-D logits vector (e.g. flattened batch of sync scores).
    # N deliberately not a multiple of 128 to exercise the padding/mask path.
    N = 1000
    preds = jax.random.normal(k1, (N,), jnp.float32)
    target = (jax.random.uniform(k2, (N,)) > 0.5).astype(jnp.float32)
    weight = jax.random.uniform(k3, (N,), jnp.float32)  # non-negative

    loss = weighted_logits_bce(preds, target, weight)
    loss = jax.block_until_ready(loss)

    ref = _reference(preds, target, weight)
    assert not jnp.isnan(loss)
    assert jnp.allclose(loss, ref, rtol=1e-5, atol=1e-4), (loss, ref)

    # also check the weight=None path
    loss2 = jax.block_until_ready(weighted_logits_bce(preds, target))
    ref2 = _reference(preds, target, jnp.ones((N,), jnp.float32))
    assert jnp.allclose(loss2, ref2, rtol=1e-5, atol=1e-4), (loss2, ref2)

    print("KERNEL_OK")
</pallas_src>

<mosaic_0001>
module attributes {stable_mosaic.version = 11 : i64} {
  func.func @_wbce_kernel(%arg0: i32, %arg1: memref<8x128xf32, #tpu.memory_space<vmem>>, %arg2: memref<8x128xf32, #tpu.memory_space<vmem>>, %arg3: memref<8x128xf32, #tpu.memory_space<vmem>>, %arg4: memref<1x1xf32, #tpu.memory_space<smem>>, %arg5: memref<1x128xf32, #tpu.memory_space<vmem>>, %arg6: memref<1x128xf32, #tpu.memory_space<vmem>>, %arg7: memref<1x128xf32, #tpu.memory_space<vmem>>, %arg8: memref<1x128xf32, #tpu.memory_space<vmem>>) attributes {dimension_semantics = [#tpu.dimension_semantics<arbitrary>], iteration_bounds = array<i64: 1>, scalar_prefetch = 0 : i64, scratch_operands = 4 : i64, tpu.core_type = #tpu.core_type<tc>, window_params = [{transform_indices = @transform_0, window_bounds = array<i64: 8, 128>}, {transform_indices = @transform_1, window_bounds = array<i64: 8, 128>}, {transform_indices = @transform_2, window_bounds = array<i64: 8, 128>}, {transform_indices = @transform_3, window_bounds = array<i64: 1, 1>}]} {
    %c0_i32 = arith.constant 0 : i32
    %0 = arith.cmpi eq, %arg0, %c0_i32 : i32
    %1 = arith.extui %0 : i1 to i32
    %c0_i32_0 = arith.constant 0 : i32
    %2 = arith.cmpi ne, %1, %c0_i32_0 : i32
    scf.if %2 {
      %cst_31 = arith.constant 0.000000e+00 : f32
      %53 = vector.broadcast %cst_31 : f32 to vector<1x128xf32>
      %c0_32 = arith.constant 0 : index
      %c0_33 = arith.constant 0 : index
      %54 = vector.load %arg5[%c0_32, %c0_33] : memref<1x128xf32, #tpu.memory_space<vmem>>, vector<1x128xf32>
      tpu.vector_store %arg5[%c0_32, %c0_33], %53 {strides = array<i32>} : memref<1x128xf32, #tpu.memory_space<vmem>>, vector<1x128xf32>,
      %cst_34 = arith.constant 0.000000e+00 : f32
      %55 = vector.broadcast %cst_34 : f32 to vector<1x128xf32>
      %c0_35 = arith.constant 0 : index
      %c0_36 = arith.constant 0 : index
      %56 = vector.load %arg6[%c0_35, %c0_36] : memref<1x128xf32, #tpu.memory_space<vmem>>, vector<1x128xf32>
      tpu.vector_store %arg6[%c0_35, %c0_36], %55 {strides = array<i32>} : memref<1x128xf32, #tpu.memory_space<vmem>>, vector<1x128xf32>,
      %cst_37 = arith.constant 0.000000e+00 : f32
      %57 = vector.broadcast %cst_37 : f32 to vector<1x128xf32>
      %c0_38 = arith.constant 0 : index
      %c0_39 = arith.constant 0 : index
      %58 = vector.load %arg7[%c0_38, %c0_39] : memref<1x128xf32, #tpu.memory_space<vmem>>, vector<1x128xf32>
      tpu.vector_store %arg7[%c0_38, %c0_39], %57 {strides = array<i32>} : memref<1x128xf32, #tpu.memory_space<vmem>>, vector<1x128xf32>,
      %cst_40 = arith.constant 0.000000e+00 : f32
      %59 = vector.broadcast %cst_40 : f32 to vector<1x128xf32>
      %c0_41 = arith.constant 0 : index
      %c0_42 = arith.constant 0 : index
      %60 = vector.load %arg8[%c0_41, %c0_42] : memref<1x128xf32, #tpu.memory_space<vmem>>, vector<1x128xf32>
      tpu.vector_store %arg8[%c0_41, %c0_42], %59 {strides = array<i32>} : memref<1x128xf32, #tpu.memory_space<vmem>>, vector<1x128xf32>,
    } else {
    }
    %c0 = arith.constant 0 : index
    %c0_1 = arith.constant 0 : index
    %3 = vector.load %arg1[%c0, %c0_1] : memref<8x128xf32, #tpu.memory_space<vmem>>, vector<8x128xf32>
    %c0_2 = arith.constant 0 : index
    %c0_3 = arith.constant 0 : index
    %4 = vector.load %arg2[%c0_2, %c0_3] : memref<8x128xf32, #tpu.memory_space<vmem>>, vector<8x128xf32>
    %c0_4 = arith.constant 0 : index
    %c0_5 = arith.constant 0 : index
    %5 = vector.load %arg3[%c0_4, %c0_5] : memref<8x128xf32, #tpu.memory_space<vmem>>, vector<8x128xf32>
    %6 = tpu.iota {dimensions = array<i32: 0>} : vector<8x128xi32>
    %7 = tpu.iota {dimensions = array<i32: 1>} : vector<8x128xi32>
    %c8_i32 = arith.constant 8 : i32
    %8 = arith.muli %arg0, %c8_i32 : i32
    %9 = vector.broadcast %8 : i32 to vector<8x128xi32>
    %10 = arith.addi %9, %6 : vector<8x128xi32>
    %c128_i32 = arith.constant 128 : i32
    %11 = vector.broadcast %c128_i32 : i32 to vector<8x128xi32>
    %12 = arith.muli %10, %11 : vector<8x128xi32>
    %13 = arith.addi %12, %7 : vector<8x128xi32>
    %c1000_i32 = arith.constant 1000 : i32
    %14 = vector.broadcast %c1000_i32 : i32 to vector<8x128xi32>
    %15 = arith.cmpi slt, %13, %14 : vector<8x128xi32>
    %cst = arith.constant 9.99999974E-5 : f32
    %16 = vector.broadcast %cst : f32 to vector<8x128xf32>
    %17 = arith.addf %5, %16 : vector<8x128xf32>
    %cst_6 = arith.constant 0.000000e+00 : f32
    %18 = vector.broadcast %cst_6 : f32 to vector<8x128xf32>
    %19 = arith.select %15, %17, %18 : vector<8x128xi1>, vector<8x128xf32>
    %20 = math.exp %3 : vector<8x128xf32>
    %cst_7 = arith.constant 1.000000e+00 : f32
    %21 = vector.broadcast %cst_7 : f32 to vector<8x128xf32>
    %22 = arith.addf %21, %20 : vector<8x128xf32>
    %23 = math.log %22 : vector<8x128xf32>
    %24 = arith.mulf %4, %3 : vector<8x128xf32>
    %25 = arith.subf %23, %24 : vector<8x128xf32>
    %cst_8 = arith.constant 0.000000e+00 : f32
    %26 = vector.broadcast %cst_8 : f32 to vector<8x128xf32>
    %27 = arith.select %15, %25, %26 : vector<8x128xi1>, vector<8x128xf32>
    %c0_9 = arith.constant 0 : index
    %c0_10 = arith.constant 0 : index
    %28 = vector.load %arg5[%c0_9, %c0_10] : memref<1x128xf32, #tpu.memory_space<vmem>>, vector<1x128xf32>
    %cst_11 = arith.constant dense<0.000000e+00> : vector<128xf32>
    %29 = vector.multi_reduction <add>, %19, %cst_11 [0] : vector<8x128xf32> to vector<128xf32>
    %30 = vector.shape_cast %29 : vector<128xf32> to vector<1x128xf32>
    %31 = arith.addf %28, %30 : vector<1x128xf32>
    %c0_12 = arith.constant 0 : index
    %c0_13 = arith.constant 0 : index
    %32 = vector.load %arg5[%c0_12, %c0_13] : memref<1x128xf32, #tpu.memory_space<vmem>>, vector<1x128xf32>
    tpu.vector_store %arg5[%c0_12, %c0_13], %31 {strides = array<i32>} : memref<1x128xf32, #tpu.memory_space<vmem>>, vector<1x128xf32>,
    %c0_14 = arith.constant 0 : index
    %c0_15 = arith.constant 0 : index
    %33 = vector.load %arg6[%c0_14, %c0_15] : memref<1x128xf32, #tpu.memory_space<vmem>>, vector<1x128xf32>
    %34 = arith.mulf %19, %19 : vector<8x128xf32>
    %cst_16 = arith.constant dense<0.000000e+00> : vector<128xf32>
    %35 = vector.multi_reduction <add>, %34, %cst_16 [0] : vector<8x128xf32> to vector<128xf32>
    %36 = vector.shape_cast %35 : vector<128xf32> to vector<1x128xf32>
    %37 = arith.addf %33, %36 : vector<1x128xf32>
    %c0_17 = arith.constant 0 : index
    %c0_18 = arith.constant 0 : index
    %38 = vector.load %arg6[%c0_17, %c0_18] : memref<1x128xf32, #tpu.memory_space<vmem>>, vector<1x128xf32>
    tpu.vector_store %arg6[%c0_17, %c0_18], %37 {strides = array<i32>} : memref<1x128xf32, #tpu.memory_space<vmem>>, vector<1x128xf32>,
    %c0_19 = arith.constant 0 : index
    %c0_20 = arith.constant 0 : index
    %39 = vector.load %arg7[%c0_19, %c0_20] : memref<1x128xf32, #tpu.memory_space<vmem>>, vector<1x128xf32>
    %cst_21 = arith.constant dense<0.000000e+00> : vector<128xf32>
    %40 = vector.multi_reduction <add>, %27, %cst_21 [0] : vector<8x128xf32> to vector<128xf32>
    %41 = vector.shape_cast %40 : vector<128xf32> to vector<1x128xf32>
    %42 = arith.addf %39, %41 : vector<1x128xf32>
    %c0_22 = arith.constant 0 : index
    %c0_23 = arith.constant 0 : index
    %43 = vector.load %arg7[%c0_22, %c0_23] : memref<1x128xf32, #tpu.memory_space<vmem>>, vector<1x128xf32>
    tpu.vector_store %arg7[%c0_22, %c0_23], %42 {strides = array<i32>} : memref<1x128xf32, #tpu.memory_space<vmem>>, vector<1x128xf32>,
    %c0_24 = arith.constant 0 : index
    %c0_25 = arith.constant 0 : index
    %44 = vector.load %arg8[%c0_24, %c0_25] : memref<1x128xf32, #tpu.memory_space<vmem>>, vector<1x128xf32>
    %45 = arith.mulf %19, %27 : vector<8x128xf32>
    %cst_26 = arith.constant dense<0.000000e+00> : vector<128xf32>
    %46 = vector.multi_reduction <add>, %45, %cst_26 [0] : vector<8x128xf32> to vector<128xf32>
    %47 = vector.shape_cast %46 : vector<128xf32> to vector<1x128xf32>
    %48 = arith.addf %44, %47 : vector<1x128xf32>
    %c0_27 = arith.constant 0 : index
    %c0_28 = arith.constant 0 : index
    %49 = vector.load %arg8[%c0_27, %c0_28] : memref<1x128xf32, #tpu.memory_space<vmem>>, vector<1x128xf32>
    tpu.vector_store %arg8[%c0_27, %c0_28], %48 {strides = array<i32>} : memref<1x128xf32, #tpu.memory_space<vmem>>, vector<1x128xf32>,
    %c0_i32_29 = arith.constant 0 : i32
    %50 = arith.cmpi eq, %arg0, %c0_i32_29 : i32
    %51 = arith.extui %50 : i1 to i32
    %c0_i32_30 = arith.constant 0 : i32
    %52 = arith.cmpi ne, %51, %c0_i32_30 : i32
    scf.if %52 {
      %c0_31 = arith.constant 0 : index
      %c0_32 = arith.constant 0 : index
      %53 = vector.load %arg5[%c0_31, %c0_32] : memref<1x128xf32, #tpu.memory_space<vmem>>, vector<1x128xf32>
      %54 = vector.shape_cast %53 : vector<1x128xf32> to vector<1x1x128xf32>
      %cst_33 = arith.constant dense<0.000000e+00> : vector<1xf32>
      %55 = vector.multi_reduction <add>, %54, %cst_33 [1, 2] : vector<1x1x128xf32> to vector<1xf32>
      %56 = vector.shape_cast %55 : vector<1xf32> to vector<1x1x1xf32>
      %57 = vector.extract %56[0, 0, 0] : f32 from vector<1x1x1xf32>
      %c0_34 = arith.constant 0 : index
      %c0_35 = arith.constant 0 : index
      %58 = vector.load %arg6[%c0_34, %c0_35] : memref<1x128xf32, #tpu.memory_space<vmem>>, vector<1x128xf32>
      %59 = vector.shape_cast %58 : vector<1x128xf32> to vector<1x1x128xf32>
      %cst_36 = arith.constant dense<0.000000e+00> : vector<1xf32>
      %60 = vector.multi_reduction <add>, %59, %cst_36 [1, 2] : vector<1x1x128xf32> to vector<1xf32>
      %61 = vector.shape_cast %60 : vector<1xf32> to vector<1x1x1xf32>
      %62 = vector.extract %61[0, 0, 0] : f32 from vector<1x1x1xf32>
      %c0_37 = arith.constant 0 : index
      %c0_38 = arith.constant 0 : index
      %63 = vector.load %arg7[%c0_37, %c0_38] : memref<1x128xf32, #tpu.memory_space<vmem>>, vector<1x128xf32>
      %64 = vector.shape_cast %63 : vector<1x128xf32> to vector<1x1x128xf32>
      %cst_39 = arith.constant dense<0.000000e+00> : vector<1xf32>
      %65 = vector.multi_reduction <add>, %64, %cst_39 [1, 2] : vector<1x1x128xf32> to vector<1xf32>
      %66 = vector.shape_cast %65 : vector<1xf32> to vector<1x1x1xf32>
      %67 = vector.extract %66[0, 0, 0] : f32 from vector<1x1x1xf32>
      %c0_40 = arith.constant 0 : index
      %c0_41 = arith.constant 0 : index
      %68 = vector.load %arg8[%c0_40, %c0_41] : memref<1x128xf32, #tpu.memory_space<vmem>>, vector<1x128xf32>
      %69 = vector.shape_cast %68 : vector<1x128xf32> to vector<1x1x128xf32>
      %cst_42 = arith.constant dense<0.000000e+00> : vector<1xf32>
      %70 = vector.multi_reduction <add>, %69, %cst_42 [1, 2] : vector<1x1x128xf32> to vector<1xf32>
      %71 = vector.shape_cast %70 : vector<1xf32> to vector<1x1x1xf32>
      %72 = vector.extract %71[0, 0, 0] : f32 from vector<1x1x1xf32>
      %73 = arith.divf %72, %57 : f32
      %cst_43 = arith.constant 5.000000e-01 : f32
      %74 = arith.mulf %67, %cst_43 : f32
      %cst_44 = arith.constant 5.000000e-01 : f32
      %75 = arith.mulf %73, %cst_44 : f32
      %76 = arith.addf %74, %75 : f32
      %cst_45 = arith.constant 1.000000e+03 : f32
      %77 = arith.divf %cst_45, %57 : f32
      %cst_46 = arith.constant 1.000000e+03 : f32
      %78 = arith.divf %cst_46, %57 : f32
      %79 = arith.mulf %77, %78 : f32
      %80 = arith.mulf %79, %62 : f32
      %cst_47 = arith.constant 1.000000e+03 : f32
      %81 = arith.subf %80, %cst_47 : f32
      %cst_48 = arith.constant 1.000000e+03 : f32
      %cst_49 = arith.constant 1.000000e+00 : f32
      %82 = arith.subf %cst_48, %cst_49 : f32
      %83 = arith.divf %81, %82 : f32
      %cst_50 = arith.constant 5.000000e-02 : f32
      %84 = arith.mulf %83, %cst_50 : f32
      %85 = arith.addf %76, %84 : f32
      %c0_51 = arith.constant 0 : index
      %c0_52 = arith.constant 0 : index
      %86 = memref.load %arg4[%c0_51, %c0_52] : memref<1x1xf32, #tpu.memory_space<smem>>
      memref.store %85, %arg4[%c0_51, %c0_52] : memref<1x1xf32, #tpu.memory_space<smem>>
    } else {
    }
    return
  }
  func.func @transform_0(%arg0: i32) -> (i32, i32) {
    %c0_i32 = arith.constant 0 : i32
    %c0_i32_0 = arith.constant 0 : i32
    return %arg0, %c0_i32 : i32, i32
  }
  func.func @transform_1(%arg0: i32) -> (i32, i32) {
    %c0_i32 = arith.constant 0 : i32
    %c0_i32_0 = arith.constant 0 : i32
    return %arg0, %c0_i32 : i32, i32
  }
  func.func @transform_2(%arg0: i32) -> (i32, i32) {
    %c0_i32 = arith.constant 0 : i32
    %c0_i32_0 = arith.constant 0 : i32
    return %arg0, %c0_i32 : i32, i32
  }
  func.func @transform_3(%arg0: i32) -> (i32, i32) {
    %c0_i32 = arith.constant 0 : i32
    %c0_i32_0 = arith.constant 0 : i32
    %c0_i32_1 = arith.constant 0 : i32
    return %c0_i32, %c0_i32_0 : i32, i32
  }
}

</mosaic_0001>

<bundles_post_ra>
// kernel: tpu_custom_call.1
= control target key start
LH: loop header
LB: loop body
LE: loop exit
PB: predicated region body
PF: predicated region fallthrough
CT: control target
= control target key end

     0   :  { %8 = vsyncpa [#allocation7], 0  ;;  %s342_s0 = inlined_call_operand.hbm [shape: f32[8,128], index: 0, kind: input, shape index: {}]   ;;  %s343_s1 = inlined_call_operand.hbm [shape: f32[8,128], index: 1, kind: input, shape index: {}]   ;;  %s344_s2 = inlined_call_operand.hbm [shape: f32[8,128], index: 2, kind: input, shape index: {}]   ;;  %s345_s3 = inlined_call_operand.hbm [shape: f32[1,1], index: 3, kind: output, shape index: {}]  }
   0x1   :  { %9 = vsyncpa [#allocation10], 0 }
   0x2   :  { %10 = vsyncpa [#allocation8], 0  ;;  %s299_s12 = smov [#allocation9]   ;;  %s300_s14 = smov [#allocation6]  }
   0x3   :  { %s27_s13 = sshll.u32 %s299_s12, 4  ;;  %s17_s15 = sshll.u32 %s300_s14, 4  ;;  %s28_s13 = int_to_ptr.vmem [resolvable:$true] %s27_s13  ;;  %s18_s15 = int_to_ptr.vmem [resolvable:$true] %s17_s15 }
   0x4   :  { %s233_s16 = scalar_lea.vmem %s28_s13, 128  ;;  %p238_p1 = scmp.lt.s32.totalorder %s28_s13, %s28_s13 }
   0x5   :  { %p234_p0 = scmp.ne.s32.totalorder %s28_s13, %s233_s16  ;;  %p239_p2 = scmp.lt.s32.totalorder %s233_s16, %s233_s16 }
   0x7   :  { %p240_p3 = por %p239_p2, %p238_p1 }
   0x9   :  { %p241_p4 = pnand %p240_p3, %p234_p0 }
   0xb   :  { %244 = shalt.err (!%p241_p4)
}
   0xc   :  { %30 = dma.hbm_to_vmem [thread:$0]  %s343_s1, 128, %s28_s13, [#allocation10]  }
   0xd   :  { %s253_s19 = scalar_lea.vmem %s18_s15, 128  ;;  %p258_p6 = scmp.lt.s32.totalorder %s18_s15, %s18_s15 }
   0xe   :  { %p254_p5 = scmp.ne.s32.totalorder %s18_s15, %s253_s19  ;;  %p259_p7 = scmp.lt.s32.totalorder %s253_s19, %s253_s19 }
  0x10   :  { %p260_p8 = por %p259_p7, %p258_p6 }
  0x12   :  { %p261_p9 = pnand %p260_p8, %p254_p5 }
  0x14   :  { %264 = shalt.err (!%p261_p9)
}
  0x15   :  { %20 = dma.hbm_to_vmem [thread:$0]  %s342_s0, 128, %s18_s15, [#allocation7]  }
  0x16   :  { %s301_s22 = smov [#allocation11]  }
  0x17   :  { %s37_s23 = sshll.u32 %s301_s22, 4  ;;  %s38_s23 = int_to_ptr.vmem [resolvable:$true] %s37_s23 }
  0x18   :  { %s273_s24 = scalar_lea.vmem %s38_s23, 128  ;;  %p278_p11 = scmp.lt.s32.totalorder %s38_s23, %s38_s23 }
  0x19   :  { %p274_p10 = scmp.ne.s32.totalorder %s38_s23, %s273_s24  ;;  %p279_p12 = scmp.lt.s32.totalorder %s273_s24, %s273_s24 }
  0x1b   :  { %p280_p13 = por %p279_p12, %p278_p11 }
  0x1d   :  { %p281_p0 = pnand %p280_p13, %p274_p10 }
  0x1f   :  { %284 = shalt.err (!%p281_p0)
}
  0x20   :  { %40 = dma.hbm_to_vmem [thread:$0]  %s344_s2, 128, %s38_s23, [#allocation10]  }
  0x21   :  { %293 = dma.done.wait [#allocation7], 128  }
  0x22   :  { %294 = vsyncadd [#allocation7], 4294967168 }
  0x23   :  { %295 = dma.done.wait [#allocation10], 256  }
  0x24   :  { %296 = vsyncadd [#allocation10], 4294967040  ;;  %v61_v0 = vlaneseq  ;;  %v302_v1 = vmov 0.0   ;;  %v60_v6 = vld [vmem:[#allocation11] sm:$0xff]  ;;  %v58_v7 = vld [vmem:[#allocation6] sm:$0xff]  ;;  %vm123_vm1 = vcmask 1040384  }
  0x25   :  { %54 = vst [vmem:[#allocation2] sm:$0x1] %v302_v1  ;;  %55 = vst [vmem:[#allocation3] sm:$0x1] %v302_v1  ;;  %v71_v8 = vadd.f32 0.0001, %v60_v6 }
  0x26   :  { %56 = vst [vmem:[#allocation4] sm:$0x1] %v302_v1  ;;  %57 = vst [vmem:[#allocation5] sm:$0x1] %v302_v1  ;;  %v62_v2 = vshrl.u32 %v61_v0, 7  ;;  %v64_v3 = vand.u32 127, %v61_v0 }
  0x27   :  { %v73_v9 = vmul.f32 1.442695, %v58_v7  ;;  %v59_v34 = vld [vmem:[#allocation9] sm:$0xff]  ;;  %s303_s13 = smov [#allocation12]  }
  0x28   :  { %v68_v4 = vmul.u32 128, %v62_v2  ;;  %v78_v35 = vmul.f32 %v59_v34, %v58_v7 }
  0x29   :  { %219 = vpow2.f32 %v73_v9 }
  0x2a   :  { %v69_v5 = vadd.s32 %v68_v4, %v64_v3 }
  0x2c   :  { %vm70_vm0 = vcmp.lt.s32.totalorder %v69_v5, 1000  ;;  %v81_v21 = vld [vmem:[#allocation2] sm:$0x1]  ;;  %v90_v24 = vld [vmem:[#allocation3] sm:$0x1] }
  0x2d   :  { %v72_v10 = vsel %vm70_vm0, %v71_v8, 0.0  ;;  %v100_v50 = vld [vmem:[#allocation4] sm:$0x1]  ;;  %v109_v53 = vld [vmem:[#allocation5] sm:$0x1] }
  0x2e   :  { %v82_v11 = vrot.slane %v72_v10, 4  ;;  %v91_v12 = vmul.f32 %v72_v10, %v72_v10 }
  0x30   :  { %v83_v13 = vadd.f32 %v82_v11, %v72_v10  ;;  %v92_v14 = vrot.slane %v91_v12, 4 }
  0x32   :  { %v84_v15 = vrot.slane %v83_v13, 2  ;;  %v93_v16 = vadd.f32 %v92_v14, %v91_v12 }
  0x34   :  { %v85_v17 = vadd.f32 %v84_v15, %v83_v13  ;;  %v94_v18 = vrot.slane %v93_v16, 2 }
  0x36   :  { %v86_v19 = vrot.slane %v85_v17, 1  ;;  %v95_v20 = vadd.f32 %v94_v18, %v93_v16  ;;  %v220_v27 = vpop.eup %219 }
  0x37   :  { %v75_v28 = vadd.f32 1.0, %v220_v27 }
  0x38   :  { %v87_v22 = vadd.f32 %v86_v19, %v85_v17  ;;  %v96_v23 = vrot.slane %v95_v20, 1 }
  0x39   :  { %221 = vlog2.f32 %v75_v28 }
  0x3a   :  { %v88_v25 = vadd.f32 %v87_v22, %v81_v21  ;;  %v97_v26 = vadd.f32 %v96_v23, %v95_v20 }
  0x3c   :  { %89 = vst [vmem:[#allocation2] sm:$0x1] %v88_v25  ;;  %v98_v29 = vadd.f32 %v97_v26, %v90_v24 }
  0x3e   :  { %99 = vst [vmem:[#allocation3] sm:$0x1] %v98_v29 }
  0x43   :  { %v122_v30 = vld [vmem:[#allocation2] sm:$0x1] }
  0x44   :  { %v124_v31 = vsel %vm123_vm1, %v122_v30, 0.0 }
  0x45   :  { %125 = vadd.xlane.f32.xlu0 %v124_v31  ;;  %v134_v32 = vld [vmem:[#allocation3] sm:$0x1] }
  0x46   :  { %v135_v33 = vsel %vm123_vm1, %v134_v32, 0.0  ;;  %v222_v36 = vpop.eup %221 }
  0x47   :  { %v77_v37 = vmul.f32 0.6931472, %v222_v36 }
  0x49   :  { %136 = vadd.xlane.f32.xlu0 %v135_v33  ;;  %v79_v38 = vsub.f32 %v77_v37, %v78_v35 }
  0x4b   :  { %v80_v39 = vsel %vm70_vm0, %v79_v38, 0.0 }
  0x4c   :  { %v101_v40 = vrot.slane %v80_v39, 4  ;;  %v110_v41 = vmul.f32 %v80_v39, %v72_v10 }
  0x4e   :  { %v102_v42 = vadd.f32 %v101_v40, %v80_v39  ;;  %v111_v43 = vrot.slane %v110_v41, 4 }
  0x50   :  { %v103_v44 = vrot.slane %v102_v42, 2  ;;  %v112_v45 = vadd.f32 %v111_v43, %v110_v41 }
  0x52   :  { %v104_v46 = vadd.f32 %v103_v44, %v102_v42  ;;  %v113_v47 = vrot.slane %v112_v45, 2 }
  0x54   :  { %v105_v48 = vrot.slane %v104_v46, 1  ;;  %v114_v49 = vadd.f32 %v113_v47, %v112_v45 }
  0x56   :  { %v106_v51 = vadd.f32 %v105_v48, %v104_v46  ;;  %v115_v52 = vrot.slane %v114_v49, 1 }
  0x58   :  { %v107_v54 = vadd.f32 %v106_v51, %v100_v50  ;;  %v116_v55 = vadd.f32 %v115_v52, %v114_v49 }
  0x5a   :  { %108 = vst [vmem:[#allocation4] sm:$0x1] %v107_v54  ;;  %v117_v56 = vadd.f32 %v116_v55, %v109_v53 }
  0x5c   :  { %118 = vst [vmem:[#allocation5] sm:$0x1] %v117_v56 }
  0x61   :  { %v145_v57 = vld [vmem:[#allocation4] sm:$0x1] }
  0x62   :  { %v146_v58 = vsel %vm123_vm1, %v145_v57, 0.0 }
  0x63   :  { %147 = vadd.xlane.f32.xlu1 %v146_v58  ;;  %v156_v59 = vld [vmem:[#allocation5] sm:$0x1] }
  0x64   :  { %v157_v60 = vsel %vm123_vm1, %v156_v59, 0.0 }
  0x67   :  { %158 = vadd.xlane.f32.xlu1 %v157_v60 }
  0xce   :  { %v126_v61 = vpop.xlane.xlu0 %125 }
  0xcf   :  { %v127_v62 = vrot.slane %v126_v61, 4 }
  0xd1   :  { %v128_v63 = vadd.f32 %v127_v62, %v126_v61 }
  0xd2   :  { %v137_v0 = vpop.xlane.xlu0 %136 }
  0xd3   :  { %v129_v1 = vrot.slane %v128_v63, 2  ;;  %v138_v2 = vrot.slane %v137_v0, 4 }
  0xd5   :  { %v130_v3 = vadd.f32 %v129_v1, %v128_v63  ;;  %v139_v4 = vadd.f32 %v138_v2, %v137_v0 }
  0xd7   :  { %v131_v5 = vrot.slane %v130_v3, 1  ;;  %v140_v6 = vrot.slane %v139_v4, 2 }
  0xd9   :  { %v132_v7 = vadd.f32 %v131_v5, %v130_v3  ;;  %v141_v8 = vadd.f32 %v140_v6, %v139_v4 }
  0xdb   :  { %204 = vpush %v132_v7  ;;  %v142_v9 = vrot.slane %v141_v8, 1 }
  0xdd   :  { %v143_v10 = vadd.f32 %v142_v9, %v141_v8 }
  0xdf   :  { %206 = vpush %v143_v10 }
  0xec   :  { %v148_v11 = vpop.xlane.xlu1 %147 }
  0xed   :  { %v149_v12 = vrot.slane %v148_v11, 4 }
  0xef   :  { %v150_v13 = vadd.f32 %v149_v12, %v148_v11 }
  0xf0   :  { %v159_v14 = vpop.xlane.xlu1 %158 }
  0xf1   :  { %v151_v15 = vrot.slane %v150_v13, 2  ;;  %v160_v16 = vrot.slane %v159_v14, 4 }
  0xf3   :  { %v161_v17 = vadd.f32 %v160_v16, %v159_v14  ;;  %v152_v18 = vadd.f32 %v151_v15, %v150_v13 }
  0xf5   :  { %v162_v19 = vrot.slane %v161_v17, 2  ;;  %v153_v20 = vrot.slane %v152_v18, 1 }
  0xf7   :  { %v163_v21 = vadd.f32 %v162_v19, %v161_v17  ;;  %v154_v22 = vadd.f32 %v153_v20, %v152_v18 }
  0xf9   :  { %208 = vpush %v154_v22  ;;  %v164_v23 = vrot.slane %v163_v21, 1 }
  0xfb   :  { %v165_v24 = vadd.f32 %v164_v23, %v163_v21 }
  0xfd   :  { %210 = vpush %v165_v24 }
 0x10c   :  { %s205_s0 = spop %204 }
 0x10d   :  { %v167_v25 = vstv %s205_s0 }
 0x10e   :  { %223 = vrcp.f32 %v167_v25 }
 0x110   :  { %s207_s2 = spop %206 }
 0x11b   :  { %v224_v26 = vpop.eup %223 }
 0x11c   :  { %212 = vpush %v224_v26 }
 0x12a   :  { %s209_s26 = spop %208 }
 0x12b   :  { %s171_s8 = smul.f32 0.5, %s209_s26 }
 0x12e   :  { %s211_s27 = spop %210 }
 0x14d   :  { %s213_s28 = spop %212 }
 0x14e   :  { %s177_s29 = smul.f32 1000.0, %s213_s28 }
 0x14f   :  { %s170_s30 = smul.f32 %s213_s28, %s211_s27 }
 0x150   :  { %s178_s4 = smul.f32 %s177_s29, %s177_s29 }
 0x151   :  { %s172_s6 = smul.f32 0.5, %s170_s30 }
 0x152   :  { %s179_s5 = smul.f32 %s207_s2, %s178_s4 }
 0x153   :  { %s173_s10 = sadd.f32 %s172_s6, %s171_s8 }
 0x154   :  { %s203_s7 = sadd.f32 -1000.0, %s179_s5 }
 0x156   :  { %s183_s9 = smul.f32 0.001001001, %s203_s7 }
 0x158   :  { %s184_s11 = smul.f32 0.05, %s183_s9 }
 0x15a   :  { %s185_s12 = sadd.f32 %s184_s11, %s173_s10 }
 0x15c   :  { %187 = sst [smem:[#allocation12]] %s185_s12 }
 0x15d   :  { %195 = dma.smem_to_hbm %s303_s13, 16, %s345_s3, [#allocation8]  }
 0x15e   :  { %297 = dma.done.wait [#allocation8], 16  }
 0x15f   :  { %298 = vsyncadd [#allocation8], 4294967280 }
 0x160   :  { %199 = sfence }
 0x161   :  { %200 = vsyncpa [#allocation7], 1 }
 0x162   :  { %201 = vsyncpa [#allocation10], 1 }
 0x163   :  { %202 = vsyncpa [#allocation8], 1 }

</bundles_post_ra>
